<compile_context>
chip_gen: v7x
topology: tpu7x:2x2x1
jax: 0.10.0
libtpu: 0.0.40
codegen_flags: <defaults>
</compile_context>

<pallas_src>
import jax
import jax.numpy as jnp
from jax import lax
from jax.experimental import pallas as pl
from jax.experimental.pallas import tpu as pltpu

BN_EPS = 1e-5
_MAG_TINY = 1e-30          # keeps rsqrt finite at exactly-zero magnitude


def _vmem_budget():
    """(max_block_bytes, vmem_limit_bytes), tuned per TPU generation."""
    max_block, vmem_limit = 2 << 20, 32 << 20           # lean default: v7x-safe
    try:
        if pltpu.get_tpu_info().vmem_capacity_bytes >= (96 << 20):
            max_block, vmem_limit = 8 << 20, 64 << 20   # v5e / v6e (128 MiB VMEM)
    except Exception:                                    # non-TPU / interpret host
        pass
    return max_block, vmem_limit


def _pick_channel_block(num_ch, per_channel_bytes, max_block_bytes):
    """Channels per grid step: 8-aligned divisor of num_ch fitting the budget.

    Preference: even number of grid steps (balances v7x's two TensorCores via
    the "parallel" channel axis) > at least 2 steps > any fitting divisor.
    """
    cands = [d for d in range(8, num_ch + 1, 8)
             if num_ch % d == 0 and d * per_channel_bytes <= max_block_bytes]
    if cands:
        even_steps = [d for d in cands if (num_ch // d) % 2 == 0]
        if even_steps:
            return max(even_steps)
        multi = [d for d in cands if num_ch // d >= 2]
        return max(multi) if multi else max(cands)
    # No 8-aligned divisor fits: a single full-channel block is always layout
    # legal (block dim == array dim) but must still fit the VMEM budget.
    # TODO(synk): spatial-axis two-phase reduce-then-apply for bigger planes.
    assert num_ch * per_channel_bytes <= max_block_bytes, (
        "per-channel planes too large for a single VMEM block; "
        "spatial-axis two-phase path not implemented")
    return num_ch


# ---------------------------------------------------------------------------
# Kernels
# ---------------------------------------------------------------------------
def _bp_kernel(gamma_ref, beta_ref, x_ref, o_ref):
    """Bandpass: x is (N, Cb, 2*H*W) with re/im interleaved along lanes.

    r = |z|;  r_new = relu(BN(r));  y = z * (r_new / r) (same scale on the re
    and the im lane of each pair).
    """
    x = x_ref[...].astype(jnp.float32)                  # (N, Cb, L)
    nb, _, L = x.shape

    # |z|^2 duplicated onto both lanes of each (re, im) pair.  jnp.roll has
    # unambiguous numpy semantics (static slice + concatenate), so this does
    # not depend on any rotate-direction convention.  The parity mask lives at
    # (1, 1, L) and is broadcast by the select (amortized over N*Cb rows).
    x2 = x * x
    even = (lax.broadcasted_iota(jnp.int32, (1, 1, L), 2) % 2) == 0
    partner = jnp.where(even,
                        jnp.roll(x2, -1, axis=2),       # even lane: x2[l + 1]
                        jnp.roll(x2, 1, axis=2))        # odd  lane: x2[l - 1]
    r2 = x2 + partner

    invr = lax.rsqrt(r2 + _MAG_TINY)                    # one transcendental/elem
    r = r2 * invr                                       # == sqrt(r2); 0 at z == 0

    # Per-channel training-mode BN stats over (N, H, W); duplication onto the
    # two lanes of a pair leaves mean and variance unchanged.
    inv_n = 1.0 / float(nb * L)
    s1 = jnp.sum(jnp.sum(r, axis=2, keepdims=True), axis=0, keepdims=True)
    s2 = jnp.sum(jnp.sum(r2, axis=2, keepdims=True), axis=0, keepdims=True)
    mean = s1 * inv_n
    var = jnp.maximum(s2 * inv_n - mean * mean, 0.0)    # single-pass, clamped
    inv_std = lax.rsqrt(var + BN_EPS)

    # Fused BN affine on (1, Cb, 1) scalars: r_new = relu(a*r + c).
    a = gamma_ref[...].astype(jnp.float32)[None] * inv_std
    c = beta_ref[...].astype(jnp.float32)[None] - mean * a
    r_new = jnp.maximum(a * r + c, 0.0)

    # y = r_new * (cos th, sin th) = z * (r_new / r); one multiply, no divide.
    o_ref[...] = (x * (r_new * invr)).astype(o_ref.dtype)


def _lp_kernel(gamma_ref, beta_ref, x_ref, o_ref):
    """Lowpass: y = relu(BN(x)); x is (N, Cb, H*W)."""
    x = x_ref[...].astype(jnp.float32)
    nb, _, L = x.shape
    inv_n = 1.0 / float(nb * L)

    s1 = jnp.sum(jnp.sum(x, axis=2, keepdims=True), axis=0, keepdims=True)
    s2 = jnp.sum(jnp.sum(x * x, axis=2, keepdims=True), axis=0, keepdims=True)
    mean = s1 * inv_n
    var = jnp.maximum(s2 * inv_n - mean * mean, 0.0)
    inv_std = lax.rsqrt(var + BN_EPS)

    a = gamma_ref[...].astype(jnp.float32)[None] * inv_std   # (1, Cb, 1)
    c = beta_ref[...].astype(jnp.float32)[None] - mean * a
    o_ref[...] = jnp.maximum(a * x + c, 0.0).astype(o_ref.dtype)


# ---------------------------------------------------------------------------
# Wrappers (only free reshapes / views — no HBM layout passes)
# ---------------------------------------------------------------------------
def _bn_relu_call(kernel, xv, g, b, cb, vmem_limit):
    N, CH, L = xv.shape
    return pl.pallas_call(
        kernel,
        grid=(CH // cb,),
        in_specs=[
            pl.BlockSpec((cb, 1), lambda i: (i, 0)),          # gamma (VMEM)
            pl.BlockSpec((cb, 1), lambda i: (i, 0)),          # beta  (VMEM)
            pl.BlockSpec((N, cb, L), lambda i: (0, i, 0)),    # x (lane-dense)
        ],
        out_specs=pl.BlockSpec((N, cb, L), lambda i: (0, i, 0)),
        out_shape=jax.ShapeDtypeStruct((N, CH, L), xv.dtype),
        compiler_params=pltpu.CompilerParams(
            dimension_semantics=("parallel",),
            vmem_limit_bytes=vmem_limit),
    )(g, b, xv)


def bn_relu_wave_coeffs_bp(x, gamma, beta):
    """Bandpass path. x: (N, C, 6, H, W, 2); gamma/beta: (6*C,)."""
    N, C, O, H, W, two = x.shape
    assert two == 2
    CH, L = C * O, 2 * H * W
    xv = x.reshape(N, CH, L)                       # free view; channel = c*6 + o
    max_block, vmem_limit = _vmem_budget()
    cb = _pick_channel_block(CH, N * L * x.dtype.itemsize, max_block)
    y = _bn_relu_call(_bp_kernel, xv, gamma.reshape(CH, 1), beta.reshape(CH, 1),
                      cb, vmem_limit)
    return y.reshape(N, C, O, H, W, 2)             # free view back


def bn_relu_wave_coeffs_lp(x, gamma, beta):
    """Lowpass path. x: (N, C, H, W); gamma/beta: (C,)."""
    N, C, H, W = x.shape
    L = H * W
    xv = x.reshape(N, C, L)                        # free view
    max_block, vmem_limit = _vmem_budget()
    cb = _pick_channel_block(C, N * L * x.dtype.itemsize, max_block)
    y = _bn_relu_call(_lp_kernel, xv, gamma.reshape(C, 1), beta.reshape(C, 1),
                      cb, vmem_limit)
    return y.reshape(N, C, H, W)


# ---------------------------------------------------------------------------
# Pure-JAX references (for correctness check)
# ---------------------------------------------------------------------------
def _ref_bp(x, gamma, beta):
    N, C, O, H, W, _ = x.shape
    xv = x.reshape(N, C * O, H, W, 2)
    re, im = xv[..., 0], xv[..., 1]
    r = jnp.sqrt(re * re + im * im)
    mean = r.mean(axis=(0, 2, 3), keepdims=True)
    var = ((r - mean) ** 2).mean(axis=(0, 2, 3), keepdims=True)
    rn = gamma[None, :, None, None] * (r - mean) / jnp.sqrt(var + BN_EPS) \
        + beta[None, :, None, None]
    rn = jnp.maximum(rn, 0.0)
    theta = jnp.arctan2(im, re)
    y = jnp.stack([rn * jnp.cos(theta), rn * jnp.sin(theta)], axis=-1)
    return y.reshape(N, C, O, H, W, 2)


def _ref_lp(x, gamma, beta):
    mean = x.mean(axis=(0, 2, 3), keepdims=True)
    var = ((x - mean) ** 2).mean(axis=(0, 2, 3), keepdims=True)
    y = gamma[None, :, None, None] * (x - mean) / jnp.sqrt(var + BN_EPS) \
        + beta[None, :, None, None]
    return jnp.maximum(y, 0.0)


# ---------------------------------------------------------------------------
if __name__ == "__main__":
    key = jax.random.PRNGKey(0)
    N, C, O, H, W = 2, 4, 6, 16, 16
    k1, k2, k3, k4, k5, k6 = jax.random.split(key, 6)

    # Bandpass (bp=True): x is (N, C, 6, H, W, 2), BN over 6*C channels.
    x_bp = jax.random.normal(k1, (N, C, O, H, W, 2), dtype=jnp.float32)
    gamma_bp = 1.0 + 0.1 * jax.random.normal(k3, (O * C,), dtype=jnp.float32)
    beta_bp = 0.1 * jax.random.normal(k4, (O * C,), dtype=jnp.float32)

    # Lowpass (bp=False): x is (N, C, H, W), BN over C channels.
    x_lp = jax.random.normal(k2, (N, C, H, W), dtype=jnp.float32)
    gamma_lp = 1.0 + 0.1 * jax.random.normal(k5, (C,), dtype=jnp.float32)
    beta_lp = 0.1 * jax.random.normal(k6, (C,), dtype=jnp.float32)

    y_bp = jax.block_until_ready(bn_relu_wave_coeffs_bp(x_bp, gamma_bp, beta_bp))
    y_lp = jax.block_until_ready(bn_relu_wave_coeffs_lp(x_lp, gamma_lp, beta_lp))

    ref_bp = _ref_bp(x_bp, gamma_bp, beta_bp)
    ref_lp = _ref_lp(x_lp, gamma_lp, beta_lp)

    assert y_bp.shape == x_bp.shape and y_bp.dtype == x_bp.dtype
    assert y_lp.shape == x_lp.shape and y_lp.dtype == x_lp.dtype
    assert jnp.allclose(y_bp, ref_bp, atol=1e-3, rtol=1e-3), "bandpass mismatch"
    assert jnp.allclose(y_lp, ref_lp, atol=5e-4, rtol=5e-4), "lowpass mismatch"

    print("KERNEL_OK")
</pallas_src>

<mosaic_0001>
module attributes {stable_mosaic.version = 11 : i64} {
  func.func @_bp_kernel(%arg0: i32, %arg1: memref<8x1xf32, #tpu.memory_space<vmem>>, %arg2: memref<8x1xf32, #tpu.memory_space<vmem>>, %arg3: memref<2x8x512xf32, #tpu.memory_space<vmem>>, %arg4: memref<2x8x512xf32, #tpu.memory_space<vmem>>) attributes {dimension_semantics = [#tpu.dimension_semantics<parallel>], iteration_bounds = array<i64: 3>, scalar_prefetch = 0 : i64, scratch_operands = 0 : i64, tpu.core_type = #tpu.core_type<tc>, window_params = [{transform_indices = @transform_0, window_bounds = array<i64: 8, 1>}, {transform_indices = @transform_1, window_bounds = array<i64: 8, 1>}, {transform_indices = @transform_2, window_bounds = array<i64: 2, 8, 512>}, {transform_indices = @transform_3, window_bounds = array<i64: 2, 8, 512>}]} {
    %c0 = arith.constant 0 : index
    %c0_0 = arith.constant 0 : index
    %c0_1 = arith.constant 0 : index
    %0 = vector.load %arg3[%c0, %c0_0, %c0_1] : memref<2x8x512xf32, #tpu.memory_space<vmem>>, vector<2x8x512xf32>
    %1 = arith.mulf %0, %0 : vector<2x8x512xf32>
    %2 = tpu.iota {dimensions = array<i32: 2>} : vector<1x1x512xi32>
    %c2_i32 = arith.constant 2 : i32
    %c0_i32 = arith.constant 0 : i32
    %3 = arith.cmpi eq, %c2_i32, %c0_i32 : i32
    %c1_i32 = arith.constant 1 : i32
    %4 = arith.select %3, %c1_i32, %c2_i32 : i32
    %5 = vector.broadcast %4 : i32 to vector<1x1x512xi32>
    %6 = arith.remsi %2, %5 : vector<1x1x512xi32>
    %c0_i32_2 = arith.constant 0 : i32
    %7 = vector.broadcast %c0_i32_2 : i32 to vector<1x1x512xi32>
    %8 = arith.cmpi ne, %6, %7 : vector<1x1x512xi32>
    %c0_i32_3 = arith.constant 0 : i32
    %9 = vector.broadcast %c0_i32_3 : i32 to vector<1x1x512xi32>
    %10 = arith.cmpi slt, %6, %9 : vector<1x1x512xi32>
    %c0_i32_4 = arith.constant 0 : i32
    %11 = arith.cmpi slt, %4, %c0_i32_4 : i32
    %12 = vector.broadcast %11 : i1 to vector<1x1x512xi1>
    %13 = vector.broadcast %12 : vector<1x1x512xi1> to vector<1x1x512xi1>
    %14 = arith.xori %10, %13 : vector<1x1x512xi1>
    %15 = arith.andi %14, %8 : vector<1x1x512xi1>
    %16 = vector.broadcast %4 : i32 to vector<1x1x512xi32>
    %17 = arith.addi %6, %16 : vector<1x1x512xi32>
    %18 = arith.select %15, %17, %6 : vector<1x1x512xi1>, vector<1x1x512xi32>
    %c0_i32_5 = arith.constant 0 : i32
    %19 = vector.broadcast %c0_i32_5 : i32 to vector<1x1x512xi32>
    %20 = arith.cmpi eq, %18, %19 : vector<1x1x512xi32>
    %21 = vector.extract_strided_slice %1 {offsets = [0, 0, 1], sizes = [2, 8, 511], strides = [1, 1, 1]} : vector<2x8x512xf32> to vector<2x8x511xf32>
    %22 = vector.extract_strided_slice %1 {offsets = [0, 0, 0], sizes = [2, 8, 1], strides = [1, 1, 1]} : vector<2x8x512xf32> to vector<2x8x1xf32>
    %23 = tpu.concatenate %21, %22 in 2 : vector<2x8x511xf32>, vector<2x8x1xf32> -> vector<2x8x512xf32>
    %24 = vector.extract_strided_slice %1 {offsets = [0, 0, 511], sizes = [2, 8, 1], strides = [1, 1, 1]} : vector<2x8x512xf32> to vector<2x8x1xf32>
    %25 = vector.extract_strided_slice %1 {offsets = [0, 0, 0], sizes = [2, 8, 511], strides = [1, 1, 1]} : vector<2x8x512xf32> to vector<2x8x511xf32>
    %26 = tpu.concatenate %24, %25 in 2 : vector<2x8x1xf32>, vector<2x8x511xf32> -> vector<2x8x512xf32>
    %27 = vector.shape_cast %20 : vector<1x1x512xi1> to vector<1x1x512xi1>
    %28 = vector.broadcast %27 : vector<1x1x512xi1> to vector<2x8x512xi1>
    %29 = arith.select %28, %23, %26 : vector<2x8x512xi1>, vector<2x8x512xf32>
    %30 = arith.addf %1, %29 : vector<2x8x512xf32>
    %cst = arith.constant 1.000000e-30 : f32
    %31 = vector.broadcast %cst : f32 to vector<2x8x512xf32>
    %32 = arith.addf %30, %31 : vector<2x8x512xf32>
    %33 = math.rsqrt %32 : vector<2x8x512xf32>
    %34 = arith.mulf %30, %33 : vector<2x8x512xf32>
    %cst_6 = arith.constant dense<0.000000e+00> : vector<2x8xf32>
    %35 = vector.multi_reduction <add>, %34, %cst_6 [2] : vector<2x8x512xf32> to vector<2x8xf32>
    %36 = vector.shape_cast %35 : vector<2x8xf32> to vector<2x8x1xf32>
    %cst_7 = arith.constant dense<0.000000e+00> : vector<8x1xf32>
    %37 = vector.multi_reduction <add>, %36, %cst_7 [0] : vector<2x8x1xf32> to vector<8x1xf32>
    %38 = vector.shape_cast %37 : vector<8x1xf32> to vector<1x8x1xf32>
    %cst_8 = arith.constant dense<0.000000e+00> : vector<2x8xf32>
    %39 = vector.multi_reduction <add>, %30, %cst_8 [2] : vector<2x8x512xf32> to vector<2x8xf32>
    %40 = vector.shape_cast %39 : vector<2x8xf32> to vector<2x8x1xf32>
    %cst_9 = arith.constant dense<0.000000e+00> : vector<8x1xf32>
    %41 = vector.multi_reduction <add>, %40, %cst_9 [0] : vector<2x8x1xf32> to vector<8x1xf32>
    %42 = vector.shape_cast %41 : vector<8x1xf32> to vector<1x8x1xf32>
    %cst_10 = arith.constant 9.765625E-4 : f32
    %43 = vector.broadcast %cst_10 : f32 to vector<1x8x1xf32>
    %44 = arith.mulf %38, %43 : vector<1x8x1xf32>
    %cst_11 = arith.constant 9.765625E-4 : f32
    %45 = vector.broadcast %cst_11 : f32 to vector<1x8x1xf32>
    %46 = arith.mulf %42, %45 : vector<1x8x1xf32>
    %47 = arith.mulf %44, %44 : vector<1x8x1xf32>
    %48 = arith.subf %46, %47 : vector<1x8x1xf32>
    %cst_12 = arith.constant 0.000000e+00 : f32
    %49 = vector.broadcast %cst_12 : f32 to vector<1x8x1xf32>
    %50 = arith.maximumf %48, %49 : vector<1x8x1xf32>
    %cst_13 = arith.constant 9.99999974E-6 : f32
    %51 = vector.broadcast %cst_13 : f32 to vector<1x8x1xf32>
    %52 = arith.addf %50, %51 : vector<1x8x1xf32>
    %53 = math.rsqrt %52 : vector<1x8x1xf32>
    %c0_14 = arith.constant 0 : index
    %c0_15 = arith.constant 0 : index
    %54 = vector.load %arg1[%c0_14, %c0_15] : memref<8x1xf32, #tpu.memory_space<vmem>>, vector<8x1xf32>
    %55 = vector.shape_cast %54 : vector<8x1xf32> to vector<1x8x1xf32>
    %56 = arith.mulf %55, %53 : vector<1x8x1xf32>
    %c0_16 = arith.constant 0 : index
    %c0_17 = arith.constant 0 : index
    %57 = vector.load %arg2[%c0_16, %c0_17] : memref<8x1xf32, #tpu.memory_space<vmem>>, vector<8x1xf32>
    %58 = vector.shape_cast %57 : vector<8x1xf32> to vector<1x8x1xf32>
    %59 = arith.mulf %44, %56 : vector<1x8x1xf32>
    %60 = arith.subf %58, %59 : vector<1x8x1xf32>
    %61 = vector.broadcast %56 : vector<1x8x1xf32> to vector<2x8x512xf32>
    %62 = arith.mulf %61, %34 : vector<2x8x512xf32>
    %63 = vector.broadcast %60 : vector<1x8x1xf32> to vector<2x8x512xf32>
    %64 = arith.addf %62, %63 : vector<2x8x512xf32>
    %cst_18 = arith.constant 0.000000e+00 : f32
    %65 = vector.broadcast %cst_18 : f32 to vector<2x8x512xf32>
    %66 = arith.maximumf %64, %65 : vector<2x8x512xf32>
    %67 = arith.mulf %66, %33 : vector<2x8x512xf32>
    %68 = arith.mulf %0, %67 : vector<2x8x512xf32>
    %c0_19 = arith.constant 0 : index
    %c0_20 = arith.constant 0 : index
    %c0_21 = arith.constant 0 : index
    %69 = vector.load %arg4[%c0_19, %c0_20, %c0_21] : memref<2x8x512xf32, #tpu.memory_space<vmem>>, vector<2x8x512xf32>
    tpu.vector_store %arg4[%c0_19, %c0_20, %c0_21], %68 {strides = array<i32>} : memref<2x8x512xf32, #tpu.memory_space<vmem>>, vector<2x8x512xf32>,
    return
  }
  func.func @transform_0(%arg0: i32) -> (i32, i32) {
    %c0_i32 = arith.constant 0 : i32
    %c0_i32_0 = arith.constant 0 : i32
    return %arg0, %c0_i32 : i32, i32
  }
  func.func @transform_1(%arg0: i32) -> (i32, i32) {
    %c0_i32 = arith.constant 0 : i32
    %c0_i32_0 = arith.constant 0 : i32
    return %arg0, %c0_i32 : i32, i32
  }
  func.func @transform_2(%arg0: i32) -> (i32, i32, i32) {
    %c0_i32 = arith.constant 0 : i32
    %c0_i32_0 = arith.constant 0 : i32
    %c0_i32_1 = arith.constant 0 : i32
    return %c0_i32, %arg0, %c0_i32_0 : i32, i32, i32
  }
  func.func @transform_3(%arg0: i32) -> (i32, i32, i32) {
    %c0_i32 = arith.constant 0 : i32
    %c0_i32_0 = arith.constant 0 : i32
    %c0_i32_1 = arith.constant 0 : i32
    return %c0_i32, %arg0, %c0_i32_0 : i32, i32, i32
  }
}

</mosaic_0001>

<bundles_post_ra>
// kernel: tpu_custom_call.1
= control target key start
LH: loop header
LB: loop body
LE: loop exit
PB: predicated region body
PF: predicated region fallthrough
CT: control target
= control target key end

     0   :  { %8 = vsyncpa [#allocation3], 0  ;;  %s1186_s0 = inlined_call_operand.vmem [shape: f32[24,1], index: 0, kind: input, shape index: {}]   ;;  %s1187_s1 = inlined_call_operand.vmem [shape: f32[24,1], index: 1, kind: input, shape index: {}]   ;;  %s1188_s2 = inlined_call_operand.hbm [shape: f32[2,24,512], index: 2, kind: input, shape index: {}]   ;;  %s1189_s3 = inlined_call_operand.hbm [shape: f32[2,24,512], index: 3, kind: output, shape index: {}]  }
   0x1   :  { %10 = vsyncpa [#allocation3 + $0x1], 0 }
   0x2   :  { %11 = vsyncpa [#allocation4], 0 }
   0x3   :  { %13 = vsyncpa [#allocation4 + $0x1], 0  ;;  %s847_s12 = smov 0   ;;  %s849_s13 = smov 0  }
   0x4   :  { %s851_s14 = smov 0   ;;  %s853_s15 = smov 0  }
   0x5 LB: > { %s868_s16 = sadd.s32 4294967295, %s814_s15   ;;  %s625_s17 = sadd.s32 4294967294, %s814_s15   ;;  %s814_s15 = sphi %s853_s15, %s1210_s15   ;;  %s810_s14 = sphi %s851_s14, %s1209_s14   ;;  %s806_s13 = sphi %s849_s13, %s1208_s13   ;;  %s802_s12 = sphi %s847_s12, %s1207_s12  }
   0x6   : > { %s872_s18 = sadd.s32 1, %s814_s15   ;;  %s78_s19 = sadd.s32 1, %s810_s14 }
   0x7   : > { %s75_s20 = ssub.s32 %s814_s15, %s872_s18  ;;  %p85_p0 = scmp.ne.s32.totalorder %s810_s14, %s806_s13 }
   0x8   : > { %p76_p1 = scmp.eq.s32.totalorder %s75_s20, 0  ;;  %p86_p2 = scmp.eq.s32.totalorder %s814_s15, 0 }
   0x9   : > { %p91_p3 = scmp.ne.s32.totalorder %s806_s13, %s802_s12  ;;  %p92_p4 = scmp.eq.s32.totalorder %s868_s16, 0 }
   0xa   : > { %s884_s21 = scalar_select %p76_p1, %s810_s14, %s78_s19  }
   0xb   : > { %p886_p5 = por %p86_p2, %p85_p0  ;;  %p890_p6 = por %p92_p4, %p91_p3 }
   0xc   : > { %p115_p7 = scmp.eq.s32.totalorder %s868_s16, 2  ;;  %p121_p8 = scmp.eq.s32.totalorder %s625_s17, 2 }
   0xd   : > { %p655_p9 = scmp.lt.s32.totalorder %s814_s15, 3  ;;  %s155_s26 = sand.u32 1, %s810_s14  }
   0xe   : > { %p896_p10 = por %p115_p7, %p85_p0  ;;  %p900_p11 = por %p121_p8, %p91_p3 }
   0xf   : > { %s641_s27 = sshll.u32 %s814_s15, 9  ;;  %s628_s28 = sshll.u32 %s155_s26, 6 }
  0x10   : > { %s1193_s24 = scalar_select %p896_p10, 1, 0 }
  0x11   : > { %s1194_s25 = scalar_select %p900_p11, 1, 0 }
  0x12   : > { %s909_s4 = scalar_lea.hbm %s1188_s2, %s641_s27  ;;  %s159_s5 = scalar_lea.vmem [#allocation2], %s628_s28 }
  0x13   : > { %s166_s6 = sshll.u32 %s159_s5, 4  ;;  %p913_p12 = pnand %p655_p9, %p886_p5  ;;  %s917_s6 = int_to_ptr.vmem [resolvable:$true] %s166_s6 }
  0x14   : > { %s920_s8 = scalar_lea.sflag [#allocation3], %s155_s26  ;;  %s718_s9 = scalar_lea.hbm %s909_s4, 1024 }
  0x15   : > { %p719_p0 = scmp.ne.s32.totalorder %s909_s4, %s718_s9  ;;  %p720_p1 = pneg %p913_p12 }
  0x16   : > { %s723_s17 = scalar_lea.hbm %s1188_s2, 3072  ;;  %p724_p4 = scmp.lt.u32.totalorder %s909_s4, %s1188_s2 }
  0x17   : > { %p721_p2 = pnand %p720_p1, %p719_p0  ;;  %p725_p5 = scmp.lt.u32.totalorder %s723_s17, %s718_s9 }
  0x18   : > { %p727_p8 = scmp.lt.u32.totalorder %s718_s9, %s909_s4 }
  0x19   : > { %p722_p3 = pneg %p721_p2  ;;  %p726_p7 = por %p725_p5, %p724_p4 }
  0x1b   : > { %p728_p9 = por %p727_p8, %p726_p7 }
  0x1d   : > { %p729_p13 = pnand %p728_p9, %p722_p3 }
  0x1f   : > { %732 = shalt.err (!%p729_p13)
}
  0x20   : > { %s733_s22 = scalar_lea.vmem %s917_s6, 1024  ;;  %s816_s26 = smov [#allocation2]  }
  0x21   : > { %p734_p0 = scmp.ne.s32.totalorder %s917_s6, %s733_s22  ;;  %s738_s27 = sshll.u32 %s816_s26, 4  ;;  %s739_s27 = int_to_ptr.vmem [resolvable:$false] %s738_s27 }
  0x22   : > { %s740_s28 = scalar_lea.vmem %s739_s27, 2048  ;;  %p741_p10 = scmp.lt.s32.totalorder %s917_s6, %s739_s27 }
  0x23   : > { %p736_p2 = pnand %p734_p0, %p720_p1  ;;  %p742_p4 = scmp.lt.s32.totalorder %s740_s28, %s733_s22 }
  0x25   : > { %p737_p11 = pneg %p736_p2  ;;  %p743_p5 = por %p742_p4, %p741_p10 }
  0x27   : > { %p744_p7 = pnand %p743_p5, %p737_p11 }
  0x29   : > { %747 = shalt.err (!%p744_p7)
}
  0x2a   : > { %s817_s29 = smov 1536   ;;  %s818_s30 = smov 512  }
  0x2b   : > { %s819_s5 = smov 32   ;;  %p174_p13 = scmp.lt.s32.totalorder %s814_s15, 4 }
  0x2c   : > { %650 = dma.hbm_to_vmem [thread:$0]  (!%p913_p12), %s909_s4, 1024, %s917_s6, %s920_s8, %s817_s29, %s818_s30, %s819_s5  }
  0x2d   : > { %p1196_p1 = scmp.ge.s32.totalorder %s814_s15, 1 }
  0x2f   : > { %p175_p3 = pnand %p1196_p1, %p174_p13 }
  0x30   : > { %s952_s9 = sand.u32 (!%p175_p3), 1, %s806_s13  }
  0x31   : > { %178 = sbr.rel (%p175_p3) target bundleno = 560 (0x230), region = 32  ;;  %s632_s10 = sshll.u32 (!%p175_p3), %s952_s9, 6 }
  0x32   : > { %s181_s11 = scalar_lea.sflag (!%p175_p3), [#allocation3], %s952_s9  ;;  %s184_s17 = scalar_lea.vmem (!%p175_p3), [#allocation2], %s632_s10 }
  0x38   : > { %793 = dma.done.wait (%p890_p6), %s181_s11, 1024  }
  0x39   : > { %795 = vsyncadd (%p890_p6), %s181_s11, 4294966272  ;;  %v962_v0 = vld [vmem:[%s184_s17 + $0x10] sm:$0xff]  ;;  %v964_v1 = vld [vmem:[%s184_s17] sm:$0xff]  ;;  %s820_s4 = smov 127   ;;  %s821_s23 = smov 1   ;;  %v239_v16 = vlaneseq  ;;  %vm320_vm0 = vcmask 1039360  }
  0x3a   : > { %v966_v2 = vld [vmem:[%s184_s17 + $0x20] sm:$0xff]  ;;  %v970_v3 = vmul.f32 %v962_v0, %v962_v0  ;;  %v231_v4 = vmul.f32 %v964_v1, %v964_v1  ;;  %v974_v5 = vld [vmem:[%s184_s17 + $0x8] sm:$0xff]  ;;  %v983_v8 = vld [vmem:[%s184_s17 + $0x30] sm:$0xff]  ;;  %vm357_vm1 = vcmask 7168   ;;  %p215_p6 = scmp.lt.s32.totalorder %s868_s16, 2  ;;  %s642_s28 = sshll.u32 %s868_s16, 9 }
  0x3b   : > { %v979_v6 = vmul.f32 %v966_v2, %v966_v2  ;;  %v232_v7 = vmul.f32 %v974_v5, %v974_v5  ;;  %v985_v9 = vld [vmem:[%s184_s17 + $0x28] sm:$0xff]  ;;  %v990_v10 = vmul.f32 %v983_v8, %v983_v8  ;;  %v994_v12 = vld [vmem:[%s184_s17 + $0x38] sm:$0xff]  ;;  %v240_v19 = vand.u32 127, %v239_v16  ;;  %s214_s29 = scalar_lea.vmem [#allocation5], %s632_s10  ;;  %s1133_s10 = scalar_lea.hbm %s1189_s3, %s642_s28 }
  0x3c   : > { %308 = vrot.lane.b32.xlu1 %v970_v3, %s820_s4  ;;  %304 = vrot.lane.b32.xlu0 %v231_v4, %s820_s4  ;;  %v236_v11 = vmul.f32 %v985_v9, %v985_v9  ;;  %v996_v13 = vld [vmem:[%s184_s17 + $0x18] sm:$0xff]  ;;  %v1001_v14 = vmul.f32 %v994_v12, %v994_v12  ;;  %s216_s6 = scalar_select %p215_p6, %s868_s16, 2 }
  0x3d   : > { %v1005_v15 = vmul.f32 %v996_v13, %v996_v13  ;;  %v241_v22 = vadd.s32 128, %v240_v19  ;;  %v248_v25 = vand.u32 1, %v240_v19  ;;  %v242_v41 = vadd.s32 256, %v240_v19  ;;  %s528_s30 = sshll.u32 %s214_s29, 4  ;;  %s515_s11 = scalar_lea.sflag [#allocation4], %s952_s9  ;;  %s1139_s30 = int_to_ptr.vmem [resolvable:$true] %s528_s30 }
  0x3e   : > { %v243_v42 = vadd.s32 384, %v240_v19  ;;  %s634_s7 = sshll.u32 %s216_s6, 3  ;;  %s748_s17 = scalar_lea.vmem %s1139_s30, 1024 }
  0x3f   : > { %v255_v26 = vand.u32 1, %v241_v22  ;;  %vm1014_vm2 = vcmp.eq.s32.totalorder %v248_v25, 0  ;;  %v262_v55 = vand.u32 1, %v242_v41  ;;  %s218_s20 = scalar_lea.vmem %s1186_s0, %s634_s7  ;;  %s222_s27 = scalar_lea.vmem %s1187_s1, %s634_s7 }
  0x40   : > { %312 = vrot.lane.b32.xlu1 %v979_v6, %s820_s4  ;;  %306 = vrot.lane.b32.xlu0 %v232_v7, %s820_s4  ;;  %v269_v56 = vand.u32 1, %v243_v42  ;;  %p749_p10 = scmp.ne.s32.totalorder %s1139_s30, %s748_s17  ;;  %p1205_p11 = scmp.ne.s32.totalorder %s1193_s24, 0 }
  0x41   : > { %vm1018_vm3 = vcmp.eq.s32.totalorder %v255_v26, 0  ;;  %vm1052_vm4 = vcmp.eq.s32.totalorder %v262_v55, 0 }
  0x42   : > { %vm1056_vm5 = vcmp.eq.s32.totalorder %v269_v56, 0  ;;  %p750_p12 = pnand %p749_p10, %p1205_p11 }
  0x44   : > { %316 = vrot.lane.b32.xlu1 %v990_v10, %s820_s4  ;;  %314 = vrot.lane.b32.xlu0 %v236_v11, %s820_s4  ;;  %p751_p8 = pneg %p750_p12 }
  0x48   : > { %341 = vrot.lane.b32.xlu1 %v1001_v14, %s821_s23  ;;  %339 = vrot.lane.b32.xlu0 %v1005_v15, %s821_s23 }
  0x4c   : > { %347 = vrot.lane.b32.xlu1 %v232_v7, %s821_s23  ;;  %345 = vrot.lane.b32.xlu0 %v231_v4, %s821_s23 }
  0x50   : > { %353 = vrot.lane.b32.xlu1 %v236_v11, %s821_s23  ;;  %351 = vrot.lane.b32.xlu0 %v979_v6, %s821_s23 }
  0x54   : > { %318 = vrot.lane.b32.xlu1 %v1001_v14, %s820_s4  ;;  %310 = vrot.lane.b32.xlu0 %v1005_v15, %s820_s4  ;;  %s823_s4 = smov [#allocation5]  }
  0x58   : > { %355 = vrot.lane.b32.xlu1 %v990_v10, %s821_s23  ;;  %349 = vrot.lane.b32.xlu0 %v970_v3, %s821_s23  ;;  %s752_s23 = sshll.u32 %s823_s4, 4  ;;  %s753_s23 = int_to_ptr.vmem [resolvable:$false] %s752_s23 }
  0x59   : > { %s754_s6 = scalar_lea.vmem %s753_s23, 2048  ;;  %p755_p9 = scmp.lt.s32.totalorder %s1139_s30, %s753_s23 }
  0x5a   : > { %p756_p0 = scmp.lt.s32.totalorder %s754_s6, %s748_s17 }
  0x5c   : > { %p757_p2 = por %p756_p0, %p755_p9 }
  0x5e   : > { %p758_p4 = pnand %p757_p2, %p751_p8 }
  0xae   : > { %v309_v17 = vpop.permute.xlu1 %308  ;;  %v305_v18 = vpop.permute.xlu0 %304 }
  0xb2   : > { %v313_v20 = vpop.permute.xlu1 %312  ;;  %v307_v21 = vpop.permute.xlu0 %306 }
  0xb3   : > { %v321_v33 = vsel %vm320_vm0, %v305_v18, %v307_v21  ;;  %v322_v34 = vsel %vm320_vm0, %v307_v21, %v309_v17 }
  0xb6   : > { %v317_v23 = vpop.permute.xlu1 %316  ;;  %v315_v24 = vpop.permute.xlu0 %314 }
  0xb7   : > { %v324_v43 = vsel %vm320_vm0, %v313_v20, %v315_v24  ;;  %v325_v46 = vsel %vm320_vm0, %v315_v24, %v317_v23 }
  0xba   : > { %v342_v27 = vpop.permute.xlu1 %341  ;;  %v340_v28 = vpop.permute.xlu0 %339 }
  0xbe   : > { %v348_v31 = vpop.permute.xlu1 %347  ;;  %v346_v32 = vpop.permute.xlu0 %345 }
  0xbf   : > { %v358_v35 = vsel %vm357_vm1, %v346_v32, %v348_v31  ;;  %v372_v36 = vsel %vm357_vm1, %v340_v28, %v346_v32 }
  0xc0   : > { %v382_v37 = vsel %vm1014_vm2, %v321_v33, %v372_v36  ;;  %v383_v38 = vsel %vm1018_vm3, %v322_v34, %v358_v35 }
  0xc1   : > { %v1030_v39 = vadd.f32 %v382_v37, %v231_v4  ;;  %v1032_v40 = vadd.f32 %v383_v38, %v232_v7 }
  0xc2   : > { %v354_v44 = vpop.permute.xlu1 %353  ;;  %v352_v45 = vpop.permute.xlu0 %351 }
  0xc3   : > { %v398_v47 = vadd.f32 1e-30, %v1030_v39  ;;  %v361_v48 = vsel %vm357_vm1, %v352_v45, %v354_v44  ;;  %v373_v49 = vsel %vm357_vm1, %v342_v27, %v352_v45  ;;  %v399_v50 = vadd.f32 1e-30, %v1032_v40 }
  0xc4   : > { %v386_v51 = vsel %vm1014_vm2, %v324_v43, %v373_v49  ;;  %v387_v52 = vsel %vm1018_vm3, %v325_v46, %v361_v48 }
  0xc5   : > { %v1045_v53 = vadd.f32 %v386_v51, %v979_v6  ;;  %v1047_v54 = vadd.f32 %v387_v52, %v236_v11  ;;  %700 = vrsqrt.f32 %v398_v47  ;;  %v433_v52 = vadd.f32 %v1032_v40, %v1030_v39 }
  0xc6   : > { %v319_v57 = vpop.permute.xlu1 %318  ;;  %v311_v58 = vpop.permute.xlu0 %310  ;;  %702 = vrsqrt.f32 %v399_v50 }
  0xc7   : > { %v402_v59 = vadd.f32 1e-30, %v1045_v53  ;;  %v403_v60 = vadd.f32 1e-30, %v1047_v54  ;;  %v326_v61 = vsel %vm320_vm0, %v317_v23, %v319_v57  ;;  %v338_v4 = vsel %vm320_vm0, %v319_v57, %v313_v20 }
  0xc8   : > { %v323_v6 = vsel %vm320_vm0, %v309_v17, %v311_v58  ;;  %v337_v7 = vsel %vm320_vm0, %v311_v58, %v305_v18  ;;  %v438_v57 = vadd.f32 %v1047_v54, %v1045_v53 }
  0xc9   : > { %704 = vrsqrt.f32 %v402_v59 }
  0xca   : > { %706 = vrsqrt.f32 %v403_v60  ;;  %v356_v11 = vpop.permute.xlu1 %355  ;;  %v350_v16 = vpop.permute.xlu0 %349 }
  0xcb   : > { %v362_v19 = vsel %vm357_vm1, %v354_v44, %v356_v11  ;;  %v363_v21 = vsel %vm357_vm1, %v356_v11, %v342_v27  ;;  %v359_v22 = vsel %vm357_vm1, %v348_v31, %v350_v16  ;;  %v360_v23 = vsel %vm357_vm1, %v350_v16, %v340_v28 }
  0xcc   : > { %v388_v24 = vsel %vm1052_vm4, %v326_v61, %v362_v19  ;;  %v389_v20 = vsel %vm1056_vm5, %v338_v4, %v363_v21  ;;  %v384_v17 = vsel %vm1052_vm4, %v323_v6, %v359_v22  ;;  %v385_v18 = vsel %vm1056_vm5, %v337_v7, %v360_v23  ;;  %v451_v21 = vld [vmem:[%s218_s20] sm:$0xff] }
  0xcd   : > { %v396_v25 = vadd.f32 %v388_v24, %v990_v10  ;;  %v397_v26 = vadd.f32 %v389_v20, %v1001_v14  ;;  %v392_v27 = vadd.f32 %v384_v17, %v970_v3  ;;  %v393_v28 = vadd.f32 %v385_v18, %v1005_v15  ;;  %v453_v24 = vld [vmem:[%s222_s27] sm:$0xff] }
  0xce   : > { %v822_v61 = vmov 0  }
  0xcf   : > { %v404_v29 = vadd.f32 1e-30, %v396_v25  ;;  %v405_v30 = vadd.f32 1e-30, %v397_v26  ;;  %v400_v31 = vadd.f32 1e-30, %v392_v27  ;;  %v1079_v33 = vpop.eup %700  ;;  %v434_v56 = vadd.f32 %v433_v52, %v392_v27  ;;  %698 = vset.pattern.permute.xlu1 %v822_v61  ;;  %699 = vset.pattern.permute.xlu0 %v822_v61 }
  0xd0   : > { %v401_v32 = vadd.f32 1e-30, %v393_v28  ;;  %v1081_v34 = vpop.eup %702  ;;  %v414_v15 = vmul.f32 %v1079_v33, %v1030_v39  ;;  %v439_v59 = vadd.f32 %v438_v57, %v396_v25 }
  0xd1   : > { %708 = vrsqrt.f32 %v404_v29  ;;  %v415_v36 = vmul.f32 %v1081_v34, %v1032_v40  ;;  %v435_v58 = vadd.f32 %v434_v56, %v393_v28 }
  0xd2   : > { %710 = vrsqrt.f32 %v405_v30  ;;  %v440_v60 = vadd.f32 %v439_v59, %v397_v26 }
  0xd3   : > { %v1083_v35 = vpop.eup %704  ;;  %712 = vrsqrt.f32 %v400_v31  ;;  %v422_v48 = vadd.f32 %v415_v36, %v414_v15 }
  0xd4   : > { %v1085_v10 = vpop.eup %706  ;;  %714 = vrsqrt.f32 %v401_v32  ;;  %v418_v3 = vmul.f32 %v1083_v35, %v1045_v53 }
  0xd5   : > { %v419_v14 = vmul.f32 %v1085_v10, %v1047_v54 }
  0xd7   : > { %v427_v42 = vadd.f32 %v419_v14, %v418_v3 }
  0xdb   : > { %v1095_v37 = vpop.eup %708 }
  0xdc   : > { %v1097_v38 = vpop.eup %710  ;;  %v420_v41 = vmul.f32 %v1095_v37, %v396_v25 }
  0xdd   : > { %v1100_v43 = vpop.eup %712  ;;  %v421_v45 = vmul.f32 %v1097_v38, %v397_v26 }
  0xde   : > { %v1102_v44 = vpop.eup %714  ;;  %v428_v46 = vadd.f32 %v427_v42, %v420_v41  ;;  %v416_v47 = vmul.f32 %v1100_v43, %v392_v27 }
  0xdf   : > { %v417_v50 = vmul.f32 %v1102_v44, %v393_v28 }
  0xe0   : > { %v429_v49 = vadd.f32 %v428_v46, %v421_v45  ;;  %v423_v51 = vadd.f32 %v422_v48, %v416_v47 }
  0xe2   : > { %430 = vadd.xlane.f32.xlu1 %v429_v49  ;;  %v424_v55 = vadd.f32 %v423_v51, %v417_v50 }
  0xe4   : > { %425 = vadd.xlane.f32.xlu0 %v424_v55 }
  0xe8   : > { %436 = vadd.xlane.f32.xlu0 %v435_v58 }
  0xec   : > { %441 = vadd.xlane.f32.xlu0 %v440_v60 }
 0x16f   : > { %v431_v62 = vpop.xlane.xlu1 %430 }
 0x171   : > { %v426_v63 = vpop.xlane.xlu0 %425 }
 0x172   : > { %v432_v39 = vadd.f32 %v431_v62, %v426_v63 }
 0x174   : > { %v444_v4 = vmul.f32 0.0009765625, %v432_v39 }
 0x175   : > { %v437_v40 = vpop.xlane.xlu0 %436 }
 0x176   : > { %v446_v11 = vmul.f32 %v444_v4, %v444_v4 }
 0x179   : > { %v442_v6 = vpop.xlane.xlu0 %441 }
 0x17a   : > { %v443_v7 = vadd.f32 %v442_v6, %v437_v40 }
 0x17c   : > { %v445_v16 = vmul.f32 0.0009765625, %v443_v7 }
 0x17e   : > { %v447_v53 = vsub.f32 %v445_v16, %v446_v11 }
 0x180   : > { %v448_v54 = vmax.f32 %v447_v53, 0.0 }
 0x182   : > { %v449_v19 = vadd.f32 1e-05, %v448_v54 }
 0x184   : > { %716 = vrsqrt.f32 %v449_v19 }
 0x18e   : > { %v717_v22 = vpop.eup %716 }
 0x18f   : > { %v452_v23 = vmul.f32 %v717_v22, %v451_v21 }
 0x191   : > { %458 = vperm.xlu1 %698, %v452_v23   ;;  %v454_v20 = vmul.f32 %v452_v23, %v444_v4 }
 0x193   : > { %v455_v17 = vsub.f32 %v453_v24, %v454_v20 }
 0x195   : > { %471 = vperm.xlu0 %699, %v455_v17  }
 0x210   : > { %v459_v18 = vpop.permute.xlu1 %458 }
 0x211   : > { %v461_v25 = vmul.f32 %v459_v18, %v414_v15  ;;  %v462_v26 = vmul.f32 %v459_v18, %v415_v36  ;;  %v463_v27 = vmul.f32 %v459_v18, %v416_v47  ;;  %v464_v28 = vmul.f32 %v459_v18, %v417_v50 }
 0x212   : > { %v465_v29 = vmul.f32 %v459_v18, %v418_v3  ;;  %v466_v30 = vmul.f32 %v459_v18, %v419_v14  ;;  %v467_v31 = vmul.f32 %v459_v18, %v420_v41  ;;  %v468_v32 = vmul.f32 %v459_v18, %v421_v45 }
 0x214   : > { %v472_v42 = vpop.permute.xlu0 %471 }
 0x215   : > { %v474_v46 = vadd.f32 %v472_v42, %v461_v25  ;;  %v475_v48 = vadd.f32 %v472_v42, %v462_v26  ;;  %v476_v49 = vadd.f32 %v472_v42, %v463_v27  ;;  %v477_v51 = vadd.f32 %v472_v42, %v464_v28 }
 0x216   : > { %v478_v52 = vadd.f32 %v472_v42, %v465_v29  ;;  %v479_v55 = vadd.f32 %v472_v42, %v466_v30  ;;  %v480_v56 = vadd.f32 %v472_v42, %v467_v31  ;;  %v481_v57 = vadd.f32 %v472_v42, %v468_v32 }
 0x217   : > { %v482_v58 = vmax.f32 %v474_v46, 0.0  ;;  %v483_v15 = vmax.f32 %v475_v48, 0.0  ;;  %v484_v36 = vmax.f32 %v476_v49, 0.0  ;;  %v485_v47 = vmax.f32 %v477_v51, 0.0 }
 0x218   : > { %v486_v3 = vmax.f32 %v478_v52, 0.0  ;;  %v487_v14 = vmax.f32 %v479_v55, 0.0  ;;  %v488_v50 = vmax.f32 %v480_v56, 0.0  ;;  %v489_v41 = vmax.f32 %v481_v57, 0.0 }
 0x219   : > { %v490_v45 = vmul.f32 %v1079_v33, %v482_v58  ;;  %v491_v59 = vmul.f32 %v1081_v34, %v483_v15  ;;  %v492_v60 = vmul.f32 %v1100_v43, %v484_v36  ;;  %v493_v61 = vmul.f32 %v1102_v44, %v485_v47 }
 0x21a   : > { %v494_v62 = vmul.f32 %v1083_v35, %v486_v3  ;;  %v495_v63 = vmul.f32 %v1085_v10, %v487_v14  ;;  %v496_v39 = vmul.f32 %v1095_v37, %v488_v50  ;;  %v497_v40 = vmul.f32 %v1097_v38, %v489_v41 }
 0x21b   : > { %v498_v33 = vmul.f32 %v490_v45, %v964_v1  ;;  %v499_v34 = vmul.f32 %v491_v59, %v974_v5  ;;  %v500_v43 = vmul.f32 %v492_v60, %v962_v0  ;;  %v501_v35 = vmul.f32 %v493_v61, %v996_v13 }
 0x21c   : > { %v502_v10 = vmul.f32 %v494_v62, %v966_v2  ;;  %v503_v37 = vmul.f32 %v495_v63, %v985_v9  ;;  %v504_v38 = vmul.f32 %v496_v39, %v983_v8  ;;  %v505_v1 = vmul.f32 %v497_v40, %v994_v12 }
 0x21d   : > { %506 = vst [vmem:[%s214_s29] sm:$0xff] %v498_v33  ;;  %507 = vst [vmem:[%s214_s29 + $0x8] sm:$0xff] %v499_v34 }
 0x21e   : > { %508 = vst [vmem:[%s214_s29 + $0x10] sm:$0xff] %v500_v43  ;;  %509 = vst [vmem:[%s214_s29 + $0x18] sm:$0xff] %v501_v35 }
 0x21f   : > { %510 = vst [vmem:[%s214_s29 + $0x20] sm:$0xff] %v502_v10  ;;  %511 = vst [vmem:[%s214_s29 + $0x28] sm:$0xff] %v503_v37 }
 0x220   : > { %512 = vst [vmem:[%s214_s29 + $0x30] sm:$0xff] %v504_v38  ;;  %513 = vst [vmem:[%s214_s29 + $0x38] sm:$0xff] %v505_v1 }
 0x221   : > { %761 = shalt.err (!%p758_p4)
}
 0x222   : > { %s762_s7 = scalar_lea.hbm %s1133_s10, 1024  ;;  %s766_s20 = scalar_lea.hbm %s1189_s3, 3072 }
 0x223   : > { %p763_p5 = scmp.ne.s32.totalorder %s1133_s10, %s762_s7  ;;  %p767_p1 = scmp.lt.u32.totalorder %s1133_s10, %s1189_s3 }
 0x224   : > { %p768_p3 = scmp.lt.u32.totalorder %s766_s20, %s762_s7  ;;  %p770_p10 = scmp.lt.u32.totalorder %s762_s7, %s1133_s10 }
 0x225   : > { %p764_p7 = pnand %p763_p5, %p1205_p11 }
 0x226   : > { %p769_p6 = por %p768_p3, %p767_p1 }
 0x227   : > { %p765_p13 = pneg %p764_p7 }
 0x228   : > { %p771_p12 = por %p770_p10, %p769_p6 }
 0x22a   : > { %p772_p8 = pnand %p771_p12, %p765_p13 }
 0x22c   : > { %775 = shalt.err (!%p772_p8)
}
 0x22d   : > { %s824_s27 = smov 512   ;;  %s825_s28 = smov 1536  }
 0x22e   : > { %s826_s29 = smov 32  }
 0x22f   : > { %645 = dma.vmem_to_hbm [thread:$0]  (%p1205_p11), %s1139_s30, 1024, %s1133_s10, %s515_s11, %s824_s27, %s825_s28, %s826_s29  }
 0x230 PF: > { %p656_p9 = scmp.ge.s32.totalorder %s814_s15, 2  ;;  %s543_s16 = sand.u32 1, %s802_s12  }
 0x231   : > { %p1206_p0 = scmp.ne.s32.totalorder %s1194_s25, 0  ;;  %s544_s5 = scalar_lea.sflag [#allocation4], %s543_s16 }
 0x233   : > { %p652_p2 = pnand %p656_p9, %p1206_p0 }
 0x235   : > { %797 = dma.done.wait (!%p652_p2), %s544_s5, 1024  }
 0x236   : > { %799 = vsyncadd (!%p652_p2), %s544_s5, 4294966272  ;;  %p16_p4 = scmp.ge.s32.totalorder %s872_s18, 5   ;;  %s1207_s12 = smov %s806_s13 }
 0x237   : > { %s1208_s13 = smov %s810_s14  ;;  %s1209_s14 = smov %s884_s21 }
 0x238   : > { %s1210_s15 = smov %s872_s18  ;;  %18 = sbr.rel (!%p16_p4) target bundleno = 5 (0x5), region = 83 }
 0x23f   :  { %549 = vsyncpa [#allocation3], 1 }
 0x240   :  { %551 = vsyncpa [#allocation3 + $0x1], 1 }
 0x241   :  { %552 = vsyncpa [#allocation4], 1 }
 0x242   :  { %554 = vsyncpa [#allocation4 + $0x1], 1 }

</bundles_post_ra>
